<compile_context>
chip_gen: v7x
topology: tpu7x:2x2x1
jax: 0.10.0
libtpu: 0.0.40
codegen_flags: <defaults>
</compile_context>

<pallas_src>
import jax
import jax.numpy as jnp
from jax.experimental import pallas as pl
from jax.experimental.pallas import tpu as pltpu


def classifier_kernel(x_ref, we_ref, be_ref, w1_ref, b1_ref, w2_ref, b2_ref,
                      out_ref):
    # x tile: (TB, D_IN) bf16; weights bf16; biases f32.
    x = x_ref[...]

    # encoder: Linear(D_in -> latent) + ReLU   (MXU bf16, f32 accumulate)
    h = jnp.dot(x, we_ref[...], preferred_element_type=jnp.float32) + be_ref[...]
    h = jnp.maximum(h, 0.0)

    # head: Linear(latent -> n_hidden_4) + ReLU
    h = jnp.dot(h.astype(jnp.bfloat16), w1_ref[...],
                preferred_element_type=jnp.float32) + b1_ref[...]
    h = jnp.maximum(h, 0.0)

    # head: Linear(n_hidden_4 -> padded_classes)  (logits; pad columns are 0)
    out_ref[...] = (jnp.dot(h.astype(jnp.bfloat16), w2_ref[...],
                            preferred_element_type=jnp.float32) + b2_ref[...])


def classifier_forward(x, params, *, num_classes, block_b=256):
    """x: [B, D_in] float32 -> logits [B, num_classes] float32.

    block_b: rows per grid step. 256-512 is the throughput sweet spot for
    real batches; keep 2 x (TB x D_IN x 2B) double-buffered x tiles plus the
    (tiny) weights well under ~32 MiB scoped VMEM (v7x: 64 MiB physical).
    """
    we, be, w1, b1, w2p, b2p = params
    B, d_in = x.shape
    latent = we.shape[1]
    n_hidden = w1.shape[1]
    padded_classes = w2p.shape[1]

    block_b = min(block_b, B)
    grid = (pl.cdiv(B, block_b),)
    vmem = pltpu.MemorySpace.VMEM

    # Halve the x DMA bytes; MXU runs bf16 at full rate on v6e/v7x.
    x_bf16 = x.astype(jnp.bfloat16)

    flops = 2 * B * (d_in * latent + latent * n_hidden + n_hidden * padded_classes)
    bytes_accessed = (
        x_bf16.size * 2
        + sum(int(p.size) * p.dtype.itemsize for p in params)
        + B * padded_classes * 4
    )

    out_padded = pl.pallas_call(
        classifier_kernel,
        out_shape=jax.ShapeDtypeStruct((B, padded_classes), jnp.float32),
        grid=grid,
        in_specs=[
            # batch tile of the flattened input (pipelined over the grid)
            pl.BlockSpec((block_b, d_in), lambda i: (i, 0), memory_space=vmem),
            # weights/biases: full-array blocks, constant index -> VMEM-resident
            pl.BlockSpec((d_in, latent), lambda i: (0, 0), memory_space=vmem),
            pl.BlockSpec((1, latent), lambda i: (0, 0), memory_space=vmem),
            pl.BlockSpec((latent, n_hidden), lambda i: (0, 0), memory_space=vmem),
            pl.BlockSpec((1, n_hidden), lambda i: (0, 0), memory_space=vmem),
            pl.BlockSpec((n_hidden, padded_classes), lambda i: (0, 0),
                         memory_space=vmem),
            pl.BlockSpec((1, padded_classes), lambda i: (0, 0), memory_space=vmem),
        ],
        out_specs=pl.BlockSpec((block_b, padded_classes), lambda i: (i, 0),
                               memory_space=vmem),
        compiler_params=pltpu.CompilerParams(
            # batch rows are independent -> shard across v7x's 2 TensorCores
            dimension_semantics=("parallel",),
        ),
        cost_estimate=pl.CostEstimate(
            flops=flops, transcendentals=0, bytes_accessed=bytes_accessed),
    )(x_bf16, we, be, w1, b1, w2p, b2p)

    # drop the lane-padding columns
    return out_padded[:, :num_classes]


def init_params(key, d_in, latent, n_hidden_4, num_classes, padded_classes):
    """Deterministic init mimicking nn.Linear's U(-1/sqrt(fan_in), 1/sqrt(fan_in))."""
    ks = jax.random.split(key, 6)

    def lin(kw, kb, fan_in, fan_out):
        bound = float(fan_in) ** -0.5
        w = jax.random.uniform(kw, (fan_in, fan_out), jnp.float32, -bound, bound)
        b = jax.random.uniform(kb, (1, fan_out), jnp.float32, -bound, bound)
        return w, b

    we, be = lin(ks[0], ks[1], d_in, latent)              # encoder
    w1, b1 = lin(ks[2], ks[3], latent, n_hidden_4)        # hidden
    w2, b2 = lin(ks[4], ks[5], n_hidden_4, num_classes)   # output

    # Lane-pad the classifier output to a multiple of 128 with zero columns so
    # in-kernel stores are unmasked; the wrapper slices logits back.
    w2p = jnp.zeros((n_hidden_4, padded_classes), jnp.float32).at[:, :num_classes].set(w2)
    b2p = jnp.zeros((1, padded_classes), jnp.float32).at[:, :num_classes].set(b2)

    # Weights in bf16 (MXU inputs); biases stay f32 (VPU adds, v5e-safe).
    return (we.astype(jnp.bfloat16), be,
            w1.astype(jnp.bfloat16), b1,
            w2p.astype(jnp.bfloat16), b2p)


def ref_forward(x, params, num_classes):
    """Pure-JAX reference doing the same bf16-MXU / f32-accumulate math."""
    we, be, w1, b1, w2p, b2p = params
    h = jnp.dot(x.astype(jnp.bfloat16), we, preferred_element_type=jnp.float32) + be
    h = jnp.maximum(h, 0.0)
    h = jnp.dot(h.astype(jnp.bfloat16), w1, preferred_element_type=jnp.float32) + b1
    h = jnp.maximum(h, 0.0)
    out = jnp.dot(h.astype(jnp.bfloat16), w2p, preferred_element_type=jnp.float32) + b2p
    return out[:, :num_classes]


if __name__ == "__main__":
    # hparams implied by the module: latent_size=32, n_hidden_4=64,
    # num_classes=10; input already flattened (D_IN = flattened encoder input).
    B, D_IN, LATENT, N_HIDDEN_4, NUM_CLASSES = 256, 256, 32, 64, 10
    PADDED_CLASSES = 128   # lane-dense output width
    BLOCK_B = 128          # -> grid=(2,), exercises the batch pipeline

    key = jax.random.PRNGKey(0)
    kx, kp = jax.random.split(key)
    x = jax.random.normal(kx, (B, D_IN), jnp.float32)
    params = init_params(kp, D_IN, LATENT, N_HIDDEN_4, NUM_CLASSES, PADDED_CLASSES)

    logits = classifier_forward(x, params, num_classes=NUM_CLASSES, block_b=BLOCK_B)
    jax.block_until_ready(logits)

    ref = ref_forward(x, params, NUM_CLASSES)
    assert logits.shape == (B, NUM_CLASSES)
    assert jnp.allclose(logits, ref, atol=2e-2, rtol=2e-2), \
        float(jnp.max(jnp.abs(logits - ref)))

    print("KERNEL_OK")
</pallas_src>

<mosaic_0001>
module attributes {stable_mosaic.version = 11 : i64} {
  func.func @classifier_kernel(%arg0: i32, %arg1: memref<128x256xbf16, #tpu.memory_space<vmem>>, %arg2: memref<256x32xbf16, #tpu.memory_space<vmem>>, %arg3: memref<1x32xf32, #tpu.memory_space<vmem>>, %arg4: memref<32x64xbf16, #tpu.memory_space<vmem>>, %arg5: memref<1x64xf32, #tpu.memory_space<vmem>>, %arg6: memref<64x128xbf16, #tpu.memory_space<vmem>>, %arg7: memref<1x128xf32, #tpu.memory_space<vmem>>, %arg8: memref<128x128xf32, #tpu.memory_space<vmem>>) attributes {dimension_semantics = [#tpu.dimension_semantics<parallel>], iteration_bounds = array<i64: 2>, scalar_prefetch = 0 : i64, scratch_operands = 0 : i64, tpu.core_type = #tpu.core_type<tc>, window_params = [{transform_indices = @transform_0, window_bounds = array<i64: 128, 256>}, {pipeline_mode = #tpu.pipeline_mode<synchronous>, transform_indices = @transform_1, window_bounds = array<i64: 256, 32>}, {pipeline_mode = #tpu.pipeline_mode<synchronous>, transform_indices = @transform_2, window_bounds = array<i64: 1, 32>}, {pipeline_mode = #tpu.pipeline_mode<synchronous>, transform_indices = @transform_3, window_bounds = array<i64: 32, 64>}, {pipeline_mode = #tpu.pipeline_mode<synchronous>, transform_indices = @transform_4, window_bounds = array<i64: 1, 64>}, {pipeline_mode = #tpu.pipeline_mode<synchronous>, transform_indices = @transform_5, window_bounds = array<i64: 64, 128>}, {pipeline_mode = #tpu.pipeline_mode<synchronous>, transform_indices = @transform_6, window_bounds = array<i64: 1, 128>}, {transform_indices = @transform_7, window_bounds = array<i64: 128, 128>}]} {
    %c0 = arith.constant 0 : index
    %c0_0 = arith.constant 0 : index
    %0 = vector.load %arg1[%c0, %c0_0] : memref<128x256xbf16, #tpu.memory_space<vmem>>, vector<128x256xbf16>
    %c0_1 = arith.constant 0 : index
    %c0_2 = arith.constant 0 : index
    %1 = vector.load %arg2[%c0_1, %c0_2] : memref<256x32xbf16, #tpu.memory_space<vmem>>, vector<256x32xbf16>
    %cst = arith.constant dense<0.000000e+00> : vector<128x32xf32>
    %2 = tpu.matmul %0, %1, %cst {dimension_numbers = #tpu.dot_dimension_numbers<[1], [0], [0], [1], [0, 0, 1, 1], [], []>} : vector<128x256xbf16>, vector<256x32xbf16>, vector<128x32xf32> -> vector<128x32xf32>
    %c0_3 = arith.constant 0 : index
    %c0_4 = arith.constant 0 : index
    %3 = vector.load %arg3[%c0_3, %c0_4] : memref<1x32xf32, #tpu.memory_space<vmem>>, vector<1x32xf32>
    %4 = vector.broadcast %3 : vector<1x32xf32> to vector<128x32xf32>
    %5 = arith.addf %2, %4 : vector<128x32xf32>
    %cst_5 = arith.constant 0.000000e+00 : f32
    %6 = vector.broadcast %cst_5 : f32 to vector<128x32xf32>
    %7 = arith.maximumf %5, %6 : vector<128x32xf32>
    %8 = arith.truncf %7 : vector<128x32xf32> to vector<128x32xbf16>
    %c0_6 = arith.constant 0 : index
    %c0_7 = arith.constant 0 : index
    %9 = vector.load %arg4[%c0_6, %c0_7] : memref<32x64xbf16, #tpu.memory_space<vmem>>, vector<32x64xbf16>
    %cst_8 = arith.constant dense<0.000000e+00> : vector<128x64xf32>
    %10 = tpu.matmul %8, %9, %cst_8 {dimension_numbers = #tpu.dot_dimension_numbers<[1], [0], [0], [1], [0, 0, 1, 1], [], []>} : vector<128x32xbf16>, vector<32x64xbf16>, vector<128x64xf32> -> vector<128x64xf32>
    %c0_9 = arith.constant 0 : index
    %c0_10 = arith.constant 0 : index
    %11 = vector.load %arg5[%c0_9, %c0_10] : memref<1x64xf32, #tpu.memory_space<vmem>>, vector<1x64xf32>
    %12 = vector.broadcast %11 : vector<1x64xf32> to vector<128x64xf32>
    %13 = arith.addf %10, %12 : vector<128x64xf32>
    %cst_11 = arith.constant 0.000000e+00 : f32
    %14 = vector.broadcast %cst_11 : f32 to vector<128x64xf32>
    %15 = arith.maximumf %13, %14 : vector<128x64xf32>
    %16 = arith.truncf %15 : vector<128x64xf32> to vector<128x64xbf16>
    %c0_12 = arith.constant 0 : index
    %c0_13 = arith.constant 0 : index
    %17 = vector.load %arg6[%c0_12, %c0_13] : memref<64x128xbf16, #tpu.memory_space<vmem>>, vector<64x128xbf16>
    %cst_14 = arith.constant dense<0.000000e+00> : vector<128x128xf32>
    %18 = tpu.matmul %16, %17, %cst_14 {dimension_numbers = #tpu.dot_dimension_numbers<[1], [0], [0], [1], [0, 0, 1, 1], [], []>} : vector<128x64xbf16>, vector<64x128xbf16>, vector<128x128xf32> -> vector<128x128xf32>
    %c0_15 = arith.constant 0 : index
    %c0_16 = arith.constant 0 : index
    %19 = vector.load %arg7[%c0_15, %c0_16] : memref<1x128xf32, #tpu.memory_space<vmem>>, vector<1x128xf32>
    %20 = vector.broadcast %19 : vector<1x128xf32> to vector<128x128xf32>
    %21 = arith.addf %18, %20 : vector<128x128xf32>
    %c0_17 = arith.constant 0 : index
    %c0_18 = arith.constant 0 : index
    %22 = vector.load %arg8[%c0_17, %c0_18] : memref<128x128xf32, #tpu.memory_space<vmem>>, vector<128x128xf32>
    tpu.vector_store %arg8[%c0_17, %c0_18], %21 {strides = array<i32>} : memref<128x128xf32, #tpu.memory_space<vmem>>, vector<128x128xf32>,
    return
  }
  func.func @transform_0(%arg0: i32) -> (i32, i32) {
    %c0_i32 = arith.constant 0 : i32
    %c0_i32_0 = arith.constant 0 : i32
    return %arg0, %c0_i32 : i32, i32
  }
  func.func @transform_1(%arg0: i32) -> (i32, i32) {
    %c0_i32 = arith.constant 0 : i32
    %c0_i32_0 = arith.constant 0 : i32
    %c0_i32_1 = arith.constant 0 : i32
    return %c0_i32, %c0_i32_0 : i32, i32
  }
  func.func @transform_2(%arg0: i32) -> (i32, i32) {
    %c0_i32 = arith.constant 0 : i32
    %c0_i32_0 = arith.constant 0 : i32
    %c0_i32_1 = arith.constant 0 : i32
    return %c0_i32, %c0_i32_0 : i32, i32
  }
  func.func @transform_3(%arg0: i32) -> (i32, i32) {
    %c0_i32 = arith.constant 0 : i32
    %c0_i32_0 = arith.constant 0 : i32
    %c0_i32_1 = arith.constant 0 : i32
    return %c0_i32, %c0_i32_0 : i32, i32
  }
  func.func @transform_4(%arg0: i32) -> (i32, i32) {
    %c0_i32 = arith.constant 0 : i32
    %c0_i32_0 = arith.constant 0 : i32
    %c0_i32_1 = arith.constant 0 : i32
    return %c0_i32, %c0_i32_0 : i32, i32
  }
  func.func @transform_5(%arg0: i32) -> (i32, i32) {
    %c0_i32 = arith.constant 0 : i32
    %c0_i32_0 = arith.constant 0 : i32
    %c0_i32_1 = arith.constant 0 : i32
    return %c0_i32, %c0_i32_0 : i32, i32
  }
  func.func @transform_6(%arg0: i32) -> (i32, i32) {
    %c0_i32 = arith.constant 0 : i32
    %c0_i32_0 = arith.constant 0 : i32
    %c0_i32_1 = arith.constant 0 : i32
    return %c0_i32, %c0_i32_0 : i32, i32
  }
  func.func @transform_7(%arg0: i32) -> (i32, i32) {
    %c0_i32 = arith.constant 0 : i32
    %c0_i32_0 = arith.constant 0 : i32
    return %arg0, %c0_i32 : i32, i32
  }
}

</mosaic_0001>

<bundles_post_ra>
// kernel: tpu_custom_call.1
= control target key start
LH: loop header
LB: loop body
LE: loop exit
PB: predicated region body
PF: predicated region fallthrough
CT: control target
= control target key end

     0   :  { %12 = vsyncpa [#allocation3], 0  ;;  %s1843_s0 = inlined_call_operand.hbm [shape: bf16[256,256], index: 0, kind: input, shape index: {}]   ;;  %s1844_s1 = inlined_call_operand.vmem [shape: bf16[256,32], index: 1, kind: input, shape index: {}]   ;;  %s1845_s2 = inlined_call_operand.vmem [shape: f32[1,32], index: 2, kind: input, shape index: {}]   ;;  %s1846_s3 = inlined_call_operand.vmem [shape: bf16[32,64], index: 3, kind: input, shape index: {}]   ;;  %s1847_s4 = inlined_call_operand.vmem [shape: f32[1,64], index: 4, kind: input, shape index: {}]   ;;  %s1848_s5 = inlined_call_operand.vmem [shape: bf16[64,128], index: 5, kind: input, shape index: {}]   ;;  %s1849_s6 = inlined_call_operand.vmem [shape: f32[1,128], index: 6, kind: input, shape index: {}]   ;;  %s1850_s7 = inlined_call_operand.hbm [shape: f32[256,128], index: 7, kind: output, shape index: {}]  }
   0x1   :  { %14 = vsyncpa [#allocation3 + $0x1], 0 }
   0x2   :  { %15 = vsyncpa [#allocation4], 0 }
   0x3   :  { %17 = vsyncpa [#allocation4 + $0x1], 0  ;;  %s1531_s24 = smov 0   ;;  %s1533_s25 = smov 0  }
   0x4   :  { %s1535_s26 = smov 0   ;;  %s1537_s27 = smov 0  }
   0x5 LB: > { %s1552_s28 = sadd.s32 4294967295, %s1483_s27   ;;  %s1086_s29 = sadd.s32 4294967294, %s1483_s27   ;;  %s1483_s27 = sphi %s1537_s27, %s1863_s27   ;;  %s1479_s26 = sphi %s1535_s26, %s1862_s26   ;;  %s1475_s25 = sphi %s1533_s25, %s1861_s25   ;;  %s1471_s24 = sphi %s1531_s24, %s1860_s24  }
   0x6   : > { %s1556_s30 = sadd.s32 1, %s1483_s27   ;;  %s30_s8 = sadd.s32 1, %s1479_s26 }
   0x7   : > { %s27_s9 = ssub.s32 %s1483_s27, %s1556_s30  ;;  %p37_p0 = scmp.ne.s32.totalorder %s1479_s26, %s1475_s25 }
   0x8   : > { %p28_p1 = scmp.eq.s32.totalorder %s27_s9, 0  ;;  %p38_p2 = scmp.eq.s32.totalorder %s1483_s27, 0 }
   0x9   : > { %p43_p3 = scmp.ne.s32.totalorder %s1475_s25, %s1471_s24  ;;  %p44_p4 = scmp.eq.s32.totalorder %s1552_s28, 0 }
   0xa   : > { %s1568_s10 = scalar_select %p28_p1, %s1479_s26, %s30_s8  }
   0xb   : > { %p1570_p5 = por %p38_p2, %p37_p0  ;;  %p1574_p6 = por %p44_p4, %p43_p3 }
   0xc   : > { %p193_p7 = scmp.eq.s32.totalorder %s1552_s28, 1  ;;  %p199_p8 = scmp.eq.s32.totalorder %s1086_s29, 1 }
   0xd   : > { %p1303_p10 = scmp.lt.s32.totalorder %s1483_s27, 2  ;;  %s237_s15 = sand.u32 1, %s1479_s26  }
   0xe   : > { %p1581_p11 = por %p193_p7, %p37_p0  ;;  %p1585_p12 = por %p199_p8, %p43_p3 }
   0xf   : > { %s1159_s16 = sshll.u32 %s1483_s27, 11  ;;  %s1089_s17 = sshll.u32 %s237_s15, 7 }
  0x10   : > { %s1854_s13 = scalar_select %p1581_p11, 1, 0 }
  0x11   : > { %s1855_s14 = scalar_select %p1585_p12, 1, 0 }
  0x12   : > { %s1594_s20 = scalar_lea.hbm %s1843_s0, %s1159_s16  ;;  %s241_s21 = scalar_lea.vmem [#allocation2], %s1089_s17 }
  0x13   : > { %s249_s22 = sshll.u32 %s241_s21, 4  ;;  %p1598_p13 = pnand %p1303_p10, %p1570_p5  ;;  %s1602_s22 = int_to_ptr.vmem [resolvable:$true] %s249_s22 }
  0x14   : > { %s1604_s29 = scalar_lea.sflag [#allocation3], %s237_s15  ;;  %s1387_s8 = scalar_lea.hbm %s1594_s20, 2048 }
  0x15   : > { %p1388_p0 = scmp.ne.s32.totalorder %s1594_s20, %s1387_s8  ;;  %p1389_p1 = pneg %p1598_p13 }
  0x16   : > { %s1392_s16 = scalar_lea.hbm %s1843_s0, 4096  ;;  %p1393_p4 = scmp.lt.u32.totalorder %s1594_s20, %s1843_s0 }
  0x17   : > { %p1390_p2 = pnand %p1389_p1, %p1388_p0  ;;  %p1394_p5 = scmp.lt.u32.totalorder %s1392_s16, %s1387_s8 }
  0x18   : > { %p1396_p8 = scmp.lt.u32.totalorder %s1387_s8, %s1594_s20 }
  0x19   : > { %p1391_p3 = pneg %p1390_p2  ;;  %p1395_p7 = por %p1394_p5, %p1393_p4 }
  0x1b   : > { %p1397_p10 = por %p1396_p8, %p1395_p7 }
  0x1d   : > { %p1398_p9 = pnand %p1397_p10, %p1391_p3 }
  0x1f   : > { %1401 = shalt.err (!%p1398_p9)
}
  0x20   : > { %s1402_s15 = scalar_lea.vmem %s1602_s22, 2048  ;;  %s1485_s19 = smov [#allocation2]  }
  0x21   : > { %p1403_p0 = scmp.ne.s32.totalorder %s1602_s22, %s1402_s15  ;;  %s1407_s21 = sshll.u32 %s1485_s19, 4  ;;  %s1408_s21 = int_to_ptr.vmem [resolvable:$false] %s1407_s21 }
  0x22   : > { %s1409_s9 = scalar_lea.vmem %s1408_s21, 4096  ;;  %p1410_p11 = scmp.lt.s32.totalorder %s1602_s22, %s1408_s21 }
  0x23   : > { %p1405_p2 = pnand %p1403_p0, %p1389_p1  ;;  %p1411_p4 = scmp.lt.s32.totalorder %s1409_s9, %s1402_s15 }
  0x25   : > { %p1406_p12 = pneg %p1405_p2  ;;  %p1412_p5 = por %p1411_p4, %p1410_p11 }
  0x27   : > { %p1413_p7 = pnand %p1412_p5, %p1406_p12 }
  0x29   : > { %1416 = shalt.err (!%p1413_p7)
}
  0x2a   : > { %s1486_s8 = smov 128   ;;  %s1487_s11 = smov 8  }
  0x2b   : > { %1298 = dma.hbm_to_vmem [thread:$0]  (!%p1598_p13), %s1594_s20, 2048, %s1602_s22, %s1604_s29, %s1486_s8, %s1486_s8, %s1487_s11  }
  0x2c   : > { %p1093_p9 = scmp.ge.s32.totalorder %s1483_s27, 1  ;;  %p257_p1 = scmp.lt.s32.totalorder %s1483_s27, 3 }
  0x2e   : > { %p258_p3 = pnand %p1093_p9, %p257_p1 }
  0x2f   : > { %s1635_s16 = sand.u32 (!%p258_p3), 1, %s1475_s25  }
  0x30   : > { %261 = sbr.rel (%p258_p3) target bundleno = 822 (0x336), region = 48  ;;  %s1094_s17 = sshll.u32 (!%p258_p3), %s1635_s16, 7 }
  0x31   : > { %s264_s18 = scalar_lea.sflag (!%p258_p3), [#allocation3], %s1635_s16  ;;  %s1641_s15 = scalar_lea.vmem (!%p258_p3), [#allocation2], %s1094_s17 }
  0x37   : > { %1462 = dma.done.wait (%p1574_p6), %s264_s18, 2048  }
  0x38   : > { %1464 = vsyncadd (%p1574_p6), %s264_s18, 4294965248  ;;  %v1341_v0 = vld [vmem:[%s1844_s1 + $0x40] sm:$0xff]   ;;  %v1343_v2 = vld [vmem:[%s1844_s1 + $0x48] sm:$0xff]   ;;  %vm676_vm0 = vcmask 261120   ;;  %vm861_vm1 = vcmask 523264   ;;  %p1857_p11 = scmp.ne.s32.totalorder %s1854_s13, 0 }
  0x39   : > { %v1342_v1 = vld [vmem:[%s1844_s1] sm:$0xff]   ;;  %1161 = vmatprep.subr.bf16.mxu0 %v1341_v0  ;;  %v1344_v3 = vld [vmem:[%s1844_s1 + $0x8] sm:$0xff]   ;;  %v1345_v4 = vld [vmem:[%s1844_s1 + $0x50] sm:$0xff]   ;;  %s1488_s18 = smov [#allocation5]  }
  0x3a   : > { %1162 = vmatpush3.bf16.msra.mxu0 %v1342_v1  ;;  %v1346_v5 = vld [vmem:[%s1844_s1 + $0x10] sm:$0xff]   ;;  %v1347_v6 = vld [vmem:[%s1844_s1 + $0x58] sm:$0xff]   ;;  %v1349_v8 = vld [vmem:[%s1844_s1 + $0x60] sm:$0xff]   ;;  %s1421_s20 = sshll.u32 %s1488_s18, 4  ;;  %s1422_s20 = int_to_ptr.vmem [resolvable:$false] %s1421_s20 }
  0x3b   : > { %1163 = vmatprep.subr.bf16.mxu0 %v1343_v2  ;;  %v1348_v7 = vld [vmem:[%s1844_s1 + $0x18] sm:$0xff]   ;;  %v1350_v9 = vld [vmem:[%s1844_s1 + $0x20] sm:$0xff]   ;;  %v1351_v10 = vld [vmem:[%s1844_s1 + $0x68] sm:$0xff]   ;;  %s1423_s22 = scalar_lea.vmem %s1422_s20, 4096 }
  0x3c   : > { %v1359_v11 = vld [vmem:[%s1641_s15 + $0x4] ss:$8 sps:$4 sm:$0xff]   ;;  %v1353_v13 = vld [vmem:[%s1844_s1 + $0x70] sm:$0xff]   ;;  %v1355_v15 = vld [vmem:[%s1844_s1 + $0x78] sm:$0xff]  }
  0x3d   : > { %v1352_v12 = vld [vmem:[%s1844_s1 + $0x28] sm:$0xff]   ;;  %564 = vmatprep.mubr.bf16.mxu0 %v1359_v11  ;;  %v1354_v14 = vld [vmem:[%s1844_s1 + $0x30] sm:$0xff]   ;;  %v1356_v16 = vld [vmem:[%s1844_s1 + $0x38] sm:$0xff]  }
  0x3e   : > { %1164 = vmatpush3.bf16.msra.mxu0 %v1344_v3  ;;  %v1357_v17 = vld [vmem:[%s1641_s15] ss:$8 sps:$4 sm:$0xff]   ;;  %v1360_v18 = vld [vmem:[%s1641_s15 + $0x14] ss:$8 sps:$4 sm:$0xff]   ;;  %v1362_v19 = vld [vmem:[%s1641_s15 + $0x10] ss:$8 sps:$4 sm:$0xff]  }
  0x3f   : > { %1165 = vmatprep.subr.bf16.mxu0 %v1345_v4  ;;  %v1363_v20 = vld [vmem:[%s1641_s15 + $0x24] ss:$8 sps:$4 sm:$0xff]   ;;  %v1365_v21 = vld [vmem:[%s1641_s15 + $0x20] ss:$8 sps:$4 sm:$0xff]   ;;  %v1366_v22 = vld [vmem:[%s1641_s15 + $0x34] ss:$8 sps:$4 sm:$0xff]  }
  0x40   : > { %v1368_v23 = vld [vmem:[%s1641_s15 + $0x30] ss:$8 sps:$4 sm:$0xff]   ;;  %v1369_v24 = vld [vmem:[%s1641_s15 + $0x44] ss:$8 sps:$4 sm:$0xff]   ;;  %v1371_v25 = vld [vmem:[%s1641_s15 + $0x40] ss:$8 sps:$4 sm:$0xff]  }
  0x41   : > { %v1372_v26 = vld [vmem:[%s1641_s15 + $0x54] ss:$8 sps:$4 sm:$0xff]   ;;  %v1374_v27 = vld [vmem:[%s1641_s15 + $0x50] ss:$8 sps:$4 sm:$0xff]   ;;  %v1375_v28 = vld [vmem:[%s1641_s15 + $0x64] ss:$8 sps:$4 sm:$0xff]  }
  0x42   : > { %1166 = vmatpush3.bf16.msra.mxu0 %v1346_v5  ;;  %v1377_v29 = vld [vmem:[%s1641_s15 + $0x60] ss:$8 sps:$4 sm:$0xff]   ;;  %v1378_v30 = vld [vmem:[%s1641_s15 + $0x74] ss:$8 sps:$4 sm:$0xff]   ;;  %v1380_v31 = vld [vmem:[%s1641_s15 + $0x70] ss:$8 sps:$4 sm:$0xff]  }
  0x43   : > { %1167 = vmatprep.subr.bf16.mxu0 %v1347_v6  ;;  %v1381_v32 = vld [vmem:[%s1846_s3] sm:$0xff]   ;;  %v1382_v33 = vld [vmem:[%s1846_s3 + $0x8] sm:$0xff]   ;;  %s1774_s15 = scalar_lea.vmem [#allocation5], %s1094_s17  ;;  %s1160_s17 = sshll.u32 %s1552_s28, 11 }
  0x44   : > { %1247 = vmatprep.subr.bf16.mxu1 %v1381_v32  ;;  %v1383_v34 = vld [vmem:[%s1848_s5] sm:$0xff]   ;;  %v1384_v62 = vld [vmem:[%s1848_s5 + $0x8] sm:$0xff]   ;;  %s1013_s21 = sshll.u32 %s1774_s15, 4  ;;  %s1794_s12 = scalar_lea.hbm %s1850_s7, %s1160_s17  ;;  %s1796_s21 = int_to_ptr.vmem [resolvable:$true] %s1013_s21 }
  0x45   : > { %1248 = vmatpush3.bf16.msra.mxu1 %v1381_v32  ;;  %v1723_v36 = vld [vmem:[%s1845_s2] ss:$0 sm:$0xff]  ;;  %s1000_s28 = scalar_lea.sflag [#allocation4], %s1635_s16  ;;  %s1417_s11 = scalar_lea.vmem %s1796_s21, 2048 }
  0x46   : > { %1168 = vmatpush3.bf16.msra.mxu0 %v1348_v7  ;;  %1249 = vmatprep.subr.bf16.mxu1 %v1382_v33  ;;  %p1418_p6 = scmp.ne.s32.totalorder %s1796_s21, %s1417_s11  ;;  %p1424_p8 = scmp.lt.s32.totalorder %s1796_s21, %s1422_s20 }
  0x47   : > { %1169 = vmatprep.subr.bf16.mxu0 %v1349_v8  ;;  %p1425_p10 = scmp.lt.s32.totalorder %s1423_s22, %s1417_s11 }
  0x48   : > { %p1419_p12 = pnand %p1418_p6, %p1857_p11 }
  0x49   : > { %1250 = vmatpush3.bf16.msra.mxu1 %v1382_v33  ;;  %p1426_p0 = por %p1425_p10, %p1424_p8 }
  0x4a   : > { %1170 = vmatpush3.bf16.msra.mxu0 %v1350_v9  ;;  %1267 = vmatprep.subr.bf16.mxu1 %v1383_v34  ;;  %p1420_p13 = pneg %p1419_p12 }
  0x4b   : > { %1171 = vmatprep.subr.bf16.mxu0 %v1351_v10 }
  0x4c   : > { %p1427_p2 = pnand %p1426_p0, %p1420_p13 }
  0x4e   : > { %1172 = vmatpush3.bf16.msra.mxu0 %v1352_v12 }
  0x4f   : > { %1173 = vmatprep.subr.bf16.mxu0 %v1353_v13 }
  0x52   : > { %1174 = vmatpush3.bf16.msra.mxu0 %v1354_v14 }
  0x53   : > { %1175 = vmatprep.subr.bf16.mxu0 %v1355_v15 }
  0x56   : > { %1176 = vmatpush3.bf16.msra.mxu0 %v1356_v16 }
  0x59   : > { %565 = vmatmul.mubr.bf16.vlgmr.msra.gmra.mrb[0].mxu0 %v1357_v17 }
  0x5a   : > { %572 = vmatprep.mubr.bf16.mxu0 %v1360_v18 }
  0x61   : > { %573 = vmatmul.mubr.bf16.gmra.mrb[4].mxu0 %v1362_v19 }
  0x62   : > { %580 = vmatprep.mubr.bf16.mxu0 %v1363_v20 }
  0x69   : > { %581 = vmatmul.mubr.bf16.gmra.mrb[8].mxu0 %v1365_v21 }
  0x6a   : > { %588 = vmatprep.mubr.bf16.mxu0 %v1366_v22 }
  0x71   : > { %589 = vmatmul.mubr.bf16.gmra.mrb[12].mxu0 %v1368_v23 }
  0x72   : > { %596 = vmatprep.mubr.bf16.mxu0 %v1369_v24 }
  0x79   : > { %597 = vmatmul.mubr.bf16.gmra.mrb[16].mxu0 %v1371_v25 }
  0x7a   : > { %604 = vmatprep.mubr.bf16.mxu0 %v1372_v26 }
  0x81   : > { %605 = vmatmul.mubr.bf16.gmra.mrb[20].mxu0 %v1374_v27 }
  0x82   : > { %612 = vmatprep.mubr.bf16.mxu0 %v1375_v28 }
  0x89   : > { %613 = vmatmul.mubr.bf16.gmra.mrb[24].mxu0 %v1377_v29 }
  0x8a   : > { %620 = vmatprep.mubr.bf16.mxu0 %v1378_v30 }
  0x91   : > { %621 = vmatmul.mubr.bf16.gmra.mrb[28].mxu0 %v1380_v31 }
 0x12c   : > { %v1177_v35 = vpop.f32.mrb[0].mxu0 }
 0x12d   : > { %v1178_v37 = vpop.f32.mrb[1].mxu0 }
 0x12e   : > { %v1179_v38 = vadd.f32 %v1178_v37, %v1177_v35  ;;  %v1180_v39 = vpop.f32.mrb[2].mxu0 }
 0x12f   : > { %v1181_v40 = vpop.f32.mrb[3].mxu0 }
 0x130   : > { %v567_v41 = vadd.f32 %v1179_v38, %v1723_v36  ;;  %v1182_v42 = vadd.f32 %v1181_v40, %v1180_v39 }
 0x132   : > { %v570_v43 = vadd.f32 %v1182_v42, %v1723_v36  ;;  %v629_v44 = vmax.f32 %v567_v41, 0.0 }
 0x134   : > { %v630_v45 = vmax.f32 %v570_v43, 0.0  ;;  %v1183_v46 = vpop.f32.mrb[4].mxu0 }
 0x135   : > { %v1184_v47 = vpop.f32.mrb[5].mxu0 }
 0x136   : > { %v1185_v48 = vadd.f32 %v1184_v47, %v1183_v46  ;;  %v1186_v49 = vpop.f32.mrb[6].mxu0  ;;  %v645_v50 = vpack.c.bf16 %v630_v45, %v629_v44 }
 0x137   : > { %v1187_v51 = vpop.f32.mrb[7].mxu0 }
 0x138   : > { %v575_v52 = vadd.f32 %v1185_v48, %v1723_v36  ;;  %v1188_v53 = vadd.f32 %v1187_v51, %v1186_v49  ;;  %1251 = vmatprep.mubr.msk.bf16.mxu1 %vm676_vm0, %v645_v50 }
 0x13a   : > { %v578_v54 = vadd.f32 %v1188_v53, %v1723_v36  ;;  %v631_v55 = vmax.f32 %v575_v52, 0.0 }
 0x13c   : > { %v632_v56 = vmax.f32 %v578_v54, 0.0  ;;  %v1189_v57 = vpop.f32.mrb[8].mxu0 }
 0x13d   : > { %v1190_v58 = vpop.f32.mrb[9].mxu0 }
 0x13e   : > { %v646_v59 = vpack.c.bf16 %v632_v56, %v631_v55  ;;  %v1191_v60 = vadd.f32 %v1190_v58, %v1189_v57  ;;  %v1192_v61 = vpop.f32.mrb[10].mxu0 }
 0x13f   : > { %v1193_v63 = vpop.f32.mrb[11].mxu0 }
 0x140   : > { %v583_v0 = vadd.f32 %v1191_v60, %v1723_v36  ;;  %v1194_v1 = vadd.f32 %v1193_v63, %v1192_v61  ;;  %1252 = vmatmul.mubr.msk.bf16.vlgmr.msra.gmra.mrb[0].mxu1 %vm676_vm0, %v646_v59  ;;  %v1386_v63 = vld [vmem:[%s1848_s5 + $0x18] sm:$0xff]  }
 0x141   : > { %1268 = vmatpush3.bf16.msra.mxu1 %v1383_v34 }
 0x142   : > { %v586_v2 = vadd.f32 %v1194_v1, %v1723_v36  ;;  %1269 = vmatprep.subr.bf16.mxu1 %v1384_v62  ;;  %v633_v3 = vmax.f32 %v583_v0, 0.0 }
 0x144   : > { %v634_v4 = vmax.f32 %v586_v2, 0.0  ;;  %v1195_v5 = vpop.f32.mrb[12].mxu0 }
 0x145   : > { %v1196_v6 = vpop.f32.mrb[13].mxu0  ;;  %1270 = vmatpush3.bf16.msra.mxu1 %v1384_v62  ;;  %v1385_v62 = vld [vmem:[%s1848_s5 + $0x10] sm:$0xff]  }
 0x146   : > { %v647_v7 = vpack.c.bf16 %v634_v4, %v633_v3  ;;  %v1197_v8 = vadd.f32 %v1196_v6, %v1195_v5  ;;  %v1198_v9 = vpop.f32.mrb[14].mxu0  ;;  %1271 = vmatprep.subr.bf16.mxu1 %v1385_v62 }
 0x147   : > { %v1199_v10 = vpop.f32.mrb[15].mxu0 }
 0x148   : > { %v591_v11 = vadd.f32 %v1197_v8, %v1723_v36  ;;  %v1200_v12 = vadd.f32 %v1199_v10, %v1198_v9  ;;  %1255 = vmatprep.mubr.msk.bf16.mxu1 %vm676_vm0, %v647_v7 }
 0x149   : > { %1272 = vmatpush3.bf16.msra.mxu1 %v1385_v62 }
 0x14a   : > { %v594_v13 = vadd.f32 %v1200_v12, %v1723_v36  ;;  %v635_v14 = vmax.f32 %v591_v11, 0.0  ;;  %1273 = vmatprep.subr.bf16.mxu1 %v1386_v63 }
 0x14c   : > { %v636_v15 = vmax.f32 %v594_v13, 0.0  ;;  %v1201_v16 = vpop.f32.mrb[16].mxu0 }
 0x14d   : > { %v1202_v17 = vpop.f32.mrb[17].mxu0  ;;  %1274 = vmatpush3.bf16.msra.mxu1 %v1386_v63 }
 0x14e   : > { %v648_v18 = vpack.c.bf16 %v636_v15, %v635_v14  ;;  %v1203_v19 = vadd.f32 %v1202_v17, %v1201_v16  ;;  %v1204_v20 = vpop.f32.mrb[18].mxu0 }
 0x14f   : > { %v1205_v21 = vpop.f32.mrb[19].mxu0 }
 0x150   : > { %v599_v22 = vadd.f32 %v1203_v19, %v1723_v36  ;;  %v1206_v23 = vadd.f32 %v1205_v21, %v1204_v20  ;;  %1256 = vmatmul.mubr.msk.bf16.gmra.mrb[4].mxu1 %vm676_vm0, %v648_v18 }
 0x152   : > { %v602_v24 = vadd.f32 %v1206_v23, %v1723_v36  ;;  %v637_v25 = vmax.f32 %v599_v22, 0.0 }
 0x154   : > { %v638_v26 = vmax.f32 %v602_v24, 0.0  ;;  %v1207_v27 = vpop.f32.mrb[20].mxu0 }
 0x155   : > { %v1208_v28 = vpop.f32.mrb[21].mxu0 }
 0x156   : > { %v649_v29 = vpack.c.bf16 %v638_v26, %v637_v25  ;;  %v1209_v30 = vadd.f32 %v1208_v28, %v1207_v27  ;;  %v1210_v31 = vpop.f32.mrb[22].mxu0 }
 0x157   : > { %v1211_v32 = vpop.f32.mrb[23].mxu0 }
 0x158   : > { %v607_v33 = vadd.f32 %v1209_v30, %v1723_v36  ;;  %v1212_v34 = vadd.f32 %v1211_v32, %v1210_v31  ;;  %1259 = vmatprep.mubr.msk.bf16.mxu1 %vm676_vm0, %v649_v29 }
 0x15a   : > { %v610_v35 = vadd.f32 %v1212_v34, %v1723_v36  ;;  %v639_v37 = vmax.f32 %v607_v33, 0.0 }
 0x15c   : > { %v640_v38 = vmax.f32 %v610_v35, 0.0  ;;  %v1213_v39 = vpop.f32.mrb[24].mxu0 }
 0x15d   : > { %v1214_v40 = vpop.f32.mrb[25].mxu0 }
 0x15e   : > { %v650_v41 = vpack.c.bf16 %v640_v38, %v639_v37  ;;  %v1215_v42 = vadd.f32 %v1214_v40, %v1213_v39  ;;  %v1216_v43 = vpop.f32.mrb[26].mxu0 }
 0x15f   : > { %v1217_v44 = vpop.f32.mrb[27].mxu0 }
 0x160   : > { %v615_v45 = vadd.f32 %v1215_v42, %v1723_v36  ;;  %v1218_v46 = vadd.f32 %v1217_v44, %v1216_v43  ;;  %1260 = vmatmul.mubr.msk.bf16.gmra.mrb[8].mxu1 %vm676_vm0, %v650_v41 }
 0x162   : > { %v618_v47 = vadd.f32 %v1218_v46, %v1723_v36  ;;  %v641_v48 = vmax.f32 %v615_v45, 0.0 }
 0x164   : > { %v642_v49 = vmax.f32 %v618_v47, 0.0  ;;  %v1219_v50 = vpop.f32.mrb[28].mxu0 }
 0x165   : > { %v1220_v51 = vpop.f32.mrb[29].mxu0 }
 0x166   : > { %v651_v52 = vpack.c.bf16 %v642_v49, %v641_v48  ;;  %v1221_v53 = vadd.f32 %v1220_v51, %v1219_v50  ;;  %v1222_v54 = vpop.f32.mrb[30].mxu0 }
 0x167   : > { %v1223_v55 = vpop.f32.mrb[31].mxu0 }
 0x168   : > { %v623_v56 = vadd.f32 %v1221_v53, %v1723_v36  ;;  %v1224_v57 = vadd.f32 %v1223_v55, %v1222_v54  ;;  %1263 = vmatprep.mubr.msk.bf16.mxu1 %vm676_vm0, %v651_v52 }
 0x16a   : > { %v626_v58 = vadd.f32 %v1224_v57, %v1723_v36  ;;  %v643_v59 = vmax.f32 %v623_v56, 0.0  ;;  %v1129_v36 = vld [vmem:[%s1847_s4] ss:$0 sm:$0xff] }
 0x16b   : > { %v1140_v57 = vld [vmem:[%s1849_s6] ss:$0 sm:$0xff] }
 0x16c   : > { %v644_v60 = vmax.f32 %v626_v58, 0.0 }
 0x16e   : > { %v652_v61 = vpack.c.bf16 %v644_v60, %v643_v59 }
 0x170   : > { %1264 = vmatmul.mubr.msk.bf16.gmra.mrb[12].mxu1 %vm676_vm0, %v652_v61 }
 0x213   : > { %v1253_v0 = vpop.f32.mrb[0].mxu1 }
 0x214   : > { %v744_v1 = vadd.f32 %v1253_v0, %v1129_v36  ;;  %v735_v2 = vpop.f32.mrb[1].mxu1 }
 0x215   : > { %v736_v3 = vadd.f32 %v1129_v36, %v735_v2  ;;  %v1254_v4 = vpop.f32.mrb[2].mxu1 }
 0x216   : > { %v747_v5 = vadd.f32 %v1254_v4, %v1129_v36  ;;  %v738_v6 = vpop.f32.mrb[3].mxu1  ;;  %v800_v8 = vmax.f32 %v744_v1, 0.0 }
 0x217   : > { %v739_v7 = vadd.f32 %v1129_v36, %v738_v6  ;;  %v798_v10 = vmax.f32 %v736_v3, 0.0 }
 0x218   : > { %v801_v9 = vmax.f32 %v747_v5, 0.0 }
 0x219   : > { %v799_v11 = vmax.f32 %v739_v7, 0.0 }
 0x21a   : > { %v815_v12 = vpack.c.bf16 %v801_v9, %v800_v8 }
 0x21b   : > { %v814_v13 = vpack.c.bf16 %v799_v11, %v798_v10 }
 0x21d   : > { %1275 = vmatprep.mubr.msk.bf16.mxu1 %vm861_vm1, %v814_v13 }
 0x21e   : > { %1276 = vmatmul.mubr.msk.bf16.vlgmr.msra.gmra.mrb[16].mxu1 %vm861_vm1, %v815_v12 }
 0x223   : > { %v1257_v14 = vpop.f32.mrb[4].mxu1 }
 0x224   : > { %v760_v15 = vadd.f32 %v1257_v14, %v1129_v36  ;;  %v751_v16 = vpop.f32.mrb[5].mxu1 }
 0x225   : > { %v752_v17 = vadd.f32 %v1129_v36, %v751_v16  ;;  %v1258_v18 = vpop.f32.mrb[6].mxu1 }
 0x226   : > { %v763_v19 = vadd.f32 %v1258_v18, %v1129_v36  ;;  %v754_v20 = vpop.f32.mrb[7].mxu1  ;;  %v804_v22 = vmax.f32 %v760_v15, 0.0 }
 0x227   : > { %v755_v21 = vadd.f32 %v1129_v36, %v754_v20  ;;  %v802_v24 = vmax.f32 %v752_v17, 0.0 }
 0x228   : > { %v805_v23 = vmax.f32 %v763_v19, 0.0 }
 0x229   : > { %v803_v25 = vmax.f32 %v755_v21, 0.0 }
 0x22a   : > { %v817_v26 = vpack.c.bf16 %v805_v23, %v804_v22 }
 0x22b   : > { %v816_v27 = vpack.c.bf16 %v803_v25, %v802_v24 }
 0x22d   : > { %1279 = vmatprep.mubr.msk.bf16.mxu1 %vm861_vm1, %v816_v27 }
 0x22e   : > { %1280 = vmatmul.mubr.msk.bf16.gmra.mrb[20].mxu1 %vm861_vm1, %v817_v26 }
 0x233   : > { %v1261_v28 = vpop.f32.mrb[8].mxu1 }
 0x234   : > { %v776_v29 = vadd.f32 %v1261_v28, %v1129_v36  ;;  %v767_v30 = vpop.f32.mrb[9].mxu1 }
 0x235   : > { %v768_v31 = vadd.f32 %v1129_v36, %v767_v30  ;;  %v1262_v32 = vpop.f32.mrb[10].mxu1 }
 0x236   : > { %v779_v33 = vadd.f32 %v1262_v32, %v1129_v36  ;;  %v770_v34 = vpop.f32.mrb[11].mxu1  ;;  %v808_v37 = vmax.f32 %v776_v29, 0.0 }
 0x237   : > { %v771_v35 = vadd.f32 %v1129_v36, %v770_v34  ;;  %v806_v39 = vmax.f32 %v768_v31, 0.0 }
 0x238   : > { %v809_v38 = vmax.f32 %v779_v33, 0.0 }
 0x239   : > { %v807_v40 = vmax.f32 %v771_v35, 0.0 }
 0x23a   : > { %v819_v41 = vpack.c.bf16 %v809_v38, %v808_v37 }
 0x23b   : > { %v818_v42 = vpack.c.bf16 %v807_v40, %v806_v39 }
 0x23d   : > { %1283 = vmatprep.mubr.msk.bf16.mxu1 %vm861_vm1, %v818_v42 }
 0x23e   : > { %1284 = vmatmul.mubr.msk.bf16.gmra.mrb[24].mxu1 %vm861_vm1, %v819_v41 }
 0x243   : > { %v1265_v43 = vpop.f32.mrb[12].mxu1 }
 0x244   : > { %v792_v44 = vadd.f32 %v1265_v43, %v1129_v36  ;;  %v783_v45 = vpop.f32.mrb[13].mxu1 }
 0x245   : > { %v784_v46 = vadd.f32 %v1129_v36, %v783_v45  ;;  %v1266_v47 = vpop.f32.mrb[14].mxu1 }
 0x246   : > { %v795_v48 = vadd.f32 %v1266_v47, %v1129_v36  ;;  %v786_v49 = vpop.f32.mrb[15].mxu1  ;;  %v812_v51 = vmax.f32 %v792_v44, 0.0 }
 0x247   : > { %v787_v50 = vadd.f32 %v1129_v36, %v786_v49  ;;  %v810_v53 = vmax.f32 %v784_v46, 0.0 }
 0x248   : > { %v813_v52 = vmax.f32 %v795_v48, 0.0 }
 0x249   : > { %v811_v54 = vmax.f32 %v787_v50, 0.0 }
 0x24a   : > { %v821_v55 = vpack.c.bf16 %v813_v52, %v812_v51 }
 0x24b   : > { %v820_v56 = vpack.c.bf16 %v811_v54, %v810_v53 }
 0x24d   : > { %1287 = vmatprep.mubr.msk.bf16.mxu1 %vm861_vm1, %v820_v56 }
 0x24e   : > { %1288 = vmatmul.mubr.msk.bf16.gmra.mrb[28].mxu1 %vm861_vm1, %v821_v55 }
 0x2f1   : > { %v1277_v58 = vpop.f32.mrb[16].mxu1 }
 0x2f2   : > { %v929_v59 = vadd.f32 %v1277_v58, %v1140_v57  ;;  %v920_v60 = vpop.f32.mrb[17].mxu1 }
 0x2f3   : > { %v921_v61 = vadd.f32 %v1140_v57, %v920_v60  ;;  %v1278_v62 = vpop.f32.mrb[18].mxu1 }
 0x2f4   : > { %985 = vst [vmem:[%s1774_s15 + $0x10] sm:$0xff] %v929_v59  ;;  %v932_v63 = vadd.f32 %v1278_v62, %v1140_v57  ;;  %v923_v36 = vpop.f32.mrb[19].mxu1 }
 0x2f5   : > { %983 = vst [vmem:[%s1774_s15] sm:$0xff] %v921_v61  ;;  %v924_v0 = vadd.f32 %v1140_v57, %v923_v36 }
 0x2f6   : > { %986 = vst [vmem:[%s1774_s15 + $0x18] sm:$0xff] %v932_v63 }
 0x2f7   : > { %984 = vst [vmem:[%s1774_s15 + $0x8] sm:$0xff] %v924_v0 }
 0x301   : > { %v1281_v1 = vpop.f32.mrb[20].mxu1 }
 0x302   : > { %v945_v2 = vadd.f32 %v1281_v1, %v1140_v57  ;;  %v936_v3 = vpop.f32.mrb[21].mxu1 }
 0x303   : > { %v937_v4 = vadd.f32 %v1140_v57, %v936_v3  ;;  %v1282_v5 = vpop.f32.mrb[22].mxu1 }
 0x304   : > { %989 = vst [vmem:[%s1774_s15 + $0x30] sm:$0xff] %v945_v2  ;;  %v948_v6 = vadd.f32 %v1282_v5, %v1140_v57  ;;  %v939_v7 = vpop.f32.mrb[23].mxu1 }
 0x305   : > { %987 = vst [vmem:[%s1774_s15 + $0x20] sm:$0xff] %v937_v4  ;;  %v940_v8 = vadd.f32 %v1140_v57, %v939_v7 }
 0x306   : > { %990 = vst [vmem:[%s1774_s15 + $0x38] sm:$0xff] %v948_v6 }
 0x307   : > { %988 = vst [vmem:[%s1774_s15 + $0x28] sm:$0xff] %v940_v8 }
 0x311   : > { %v1285_v9 = vpop.f32.mrb[24].mxu1 }
 0x312   : > { %v961_v10 = vadd.f32 %v1285_v9, %v1140_v57  ;;  %v952_v11 = vpop.f32.mrb[25].mxu1 }
 0x313   : > { %v953_v12 = vadd.f32 %v1140_v57, %v952_v11  ;;  %v1286_v13 = vpop.f32.mrb[26].mxu1 }
 0x314   : > { %993 = vst [vmem:[%s1774_s15 + $0x50] sm:$0xff] %v961_v10  ;;  %v964_v14 = vadd.f32 %v1286_v13, %v1140_v57  ;;  %v955_v15 = vpop.f32.mrb[27].mxu1 }
 0x315   : > { %991 = vst [vmem:[%s1774_s15 + $0x40] sm:$0xff] %v953_v12  ;;  %v956_v16 = vadd.f32 %v1140_v57, %v955_v15 }
 0x316   : > { %994 = vst [vmem:[%s1774_s15 + $0x58] sm:$0xff] %v964_v14 }
 0x317   : > { %992 = vst [vmem:[%s1774_s15 + $0x48] sm:$0xff] %v956_v16 }
 0x321   : > { %v1289_v17 = vpop.f32.mrb[28].mxu1 }
 0x322   : > { %v977_v18 = vadd.f32 %v1289_v17, %v1140_v57  ;;  %v968_v19 = vpop.f32.mrb[29].mxu1 }
 0x323   : > { %v969_v20 = vadd.f32 %v1140_v57, %v968_v19  ;;  %v1290_v21 = vpop.f32.mrb[30].mxu1 }
 0x324   : > { %997 = vst [vmem:[%s1774_s15 + $0x70] sm:$0xff] %v977_v18  ;;  %v980_v22 = vadd.f32 %v1290_v21, %v1140_v57  ;;  %v971_v23 = vpop.f32.mrb[31].mxu1 }
 0x325   : > { %995 = vst [vmem:[%s1774_s15 + $0x60] sm:$0xff] %v969_v20  ;;  %v972_v24 = vadd.f32 %v1140_v57, %v971_v23 }
 0x326   : > { %998 = vst [vmem:[%s1774_s15 + $0x78] sm:$0xff] %v980_v22 }
 0x327   : > { %996 = vst [vmem:[%s1774_s15 + $0x68] sm:$0xff] %v972_v24 }
 0x328   : > { %1430 = shalt.err (!%p1427_p2)
}
 0x329   : > { %s1431_s23 = scalar_lea.hbm %s1794_s12, 2048  ;;  %s1435_s15 = scalar_lea.hbm %s1850_s7, 4096 }
 0x32a   : > { %p1432_p4 = scmp.ne.s32.totalorder %s1794_s12, %s1431_s23  ;;  %p1436_p9 = scmp.lt.u32.totalorder %s1794_s12, %s1850_s7 }
 0x32b   : > { %p1437_p1 = scmp.lt.u32.totalorder %s1435_s15, %s1431_s23  ;;  %p1439_p6 = scmp.lt.u32.totalorder %s1431_s23, %s1794_s12 }
 0x32c   : > { %p1433_p5 = pnand %p1432_p4, %p1857_p11 }
 0x32d   : > { %p1438_p3 = por %p1437_p1, %p1436_p9 }
 0x32e   : > { %p1434_p7 = pneg %p1433_p5 }
 0x32f   : > { %p1440_p12 = por %p1439_p6, %p1438_p3 }
 0x331   : > { %p1441_p13 = pnand %p1440_p12, %p1434_p7 }
 0x333   : > { %1444 = shalt.err (!%p1441_p13)
}
 0x334   : > { %s1489_s8 = smov 128   ;;  %s1490_s11 = smov 8  }
 0x335   : > { %1293 = dma.vmem_to_hbm [thread:$0]  (%p1857_p11), %s1796_s21, 2048, %s1794_s12, %s1000_s28, %s1489_s8, %s1489_s8, %s1490_s11  }
 0x336 PF: > { %s1028_s18 = sand.u32 1, %s1471_s24   ;;  %p1858_p8 = scmp.ne.s32.totalorder %s1855_s14, 0 }
 0x337   : > { %p1859_p10 = scmp.ge.s32.totalorder %s1483_s27, 2  ;;  %s1029_s20 = scalar_lea.sflag [#allocation4], %s1028_s18 }
 0x339   : > { %p1300_p0 = pnand %p1859_p10, %p1858_p8 }
 0x33b   : > { %1466 = dma.done.wait (!%p1300_p0), %s1029_s20, 2048  }
 0x33c   : > { %1468 = vsyncadd (!%p1300_p0), %s1029_s20, 4294965248  ;;  %p20_p2 = scmp.ge.s32.totalorder %s1556_s30, 4   ;;  %s1860_s24 = smov %s1475_s25 }
 0x33d   : > { %s1861_s25 = smov %s1479_s26  ;;  %s1862_s26 = smov %s1568_s10 }
 0x33e   : > { %s1863_s27 = smov %s1556_s30  ;;  %22 = sbr.rel (!%p20_p2) target bundleno = 5 (0x5), region = 93 }
 0x345   :  { %1034 = vsyncpa [#allocation3], 1 }
 0x346   :  { %1036 = vsyncpa [#allocation3 + $0x1], 1 }
 0x347   :  { %1037 = vsyncpa [#allocation4], 1 }
 0x348   :  { %1039 = vsyncpa [#allocation4 + $0x1], 1 }

</bundles_post_ra>
